<compile_context>
chip_gen: v6e
topology: v6e:2x2x1
jax: 0.10.0
libtpu: 0.0.40
codegen_flags: <defaults>
</compile_context>

<pallas_src>
import math

import jax
import jax.numpy as jnp
from jax import lax
from jax.experimental import pallas as pl
from jax.experimental.pallas import tpu as pltpu


def _default_vmem_limit():
    # ~3/4 of physical VMEM (headroom for compiler scratch + revolving buffers),
    # capped at 100 MiB on 128 MiB parts.  Falls back to 48 MiB if the query
    # is unavailable.
    try:
        info = pltpu.get_tpu_info()
        cap = int(getattr(info, "vmem_capacity_bytes", 64 * 1024 * 1024))
    except Exception:
        cap = 64 * 1024 * 1024
    return min((cap * 3) // 4, 100 * 1024 * 1024)


_VMEM_LIMIT = _default_vmem_limit()


def _pick_tile(n, target):
    """Largest tile <= target that divides n and is a multiple of 8 (or n)."""
    t = min(n, target)
    if n % t == 0 and (t % 8 == 0 or t == n):
        return t
    for cand in range(t - (t % 8), 7, -8):
        if n % cand == 0:
            return cand
    return n


def _heads_per_group(h, d_k, d_model):
    """Heads per grid step so the per-step lane width is 128 (or full d_model)."""
    g = min(h, max(1, 128 // max(d_k, 1)))
    while g > 1 and h % g != 0:
        g -= 1
    gw = g * d_k
    if gw != d_model and gw % 128 != 0:
        g = h  # fall back to full-row groups (lane-dense: full d_model)
    return g


# ----------------------------- projection kernels ---------------------------

def _fused_qkv_kernel(x_ref, w_ref, b_ref, o_ref):
    # y = x @ W_qkv^T + b; W_qkv = [Wq*scale; Wk; Wv].  One wide matmul fills
    # the 256-wide MXU; the three d_model slabs are stored lane-dense.
    d_model = o_ref.shape[2]
    y = lax.dot_general(x_ref[...], w_ref[...], (((1,), (1,)), ((), ())),
                        preferred_element_type=jnp.float32)
    y = (y + b_ref[...]).astype(o_ref.dtype)
    o_ref[0] = y[:, :d_model]
    o_ref[1] = y[:, d_model:2 * d_model]
    o_ref[2] = y[:, 2 * d_model:]


def fused_qkv_projection(x, w_qkv, b_qkv, tile_n=512):
    """Self-attention path.  x: (N, d_model) bf16 -> (3, N, d_model) bf16."""
    n, d_in = x.shape
    d_out3 = w_qkv.shape[0]
    d_model = d_out3 // 3
    tn = _pick_tile(n, tile_n)
    return pl.pallas_call(
        _fused_qkv_kernel,
        grid=(n // tn,),
        in_specs=[
            pl.BlockSpec((tn, d_in), lambda i: (i, 0)),
            pl.BlockSpec((d_out3, d_in), lambda i: (0, 0)),
            pl.BlockSpec((1, d_out3), lambda i: (0, 0)),
        ],
        out_specs=pl.BlockSpec((3, tn, d_model), lambda i: (0, i, 0)),
        out_shape=jax.ShapeDtypeStruct((3, n, d_model), jnp.bfloat16),
        compiler_params=pltpu.CompilerParams(
            dimension_semantics=("parallel",),
            vmem_limit_bytes=_VMEM_LIMIT,
        ),
    )(x, w_qkv, b_qkv)


def _stacked_qkv_kernel(x_ref, w_ref, b_ref, o_ref):
    y = lax.dot_general(x_ref[0], w_ref[0], (((1,), (1,)), ((), ())),
                        preferred_element_type=jnp.float32)
    o_ref[0] = (y + b_ref[0]).astype(o_ref.dtype)


def stacked_qkv_projection(xs, w_qkv, b_qkv, tile_n=512):
    """Cross-attention path.  xs: (3, N, d_model) bf16 -> (3, N, d_model) bf16."""
    _, n, d_in = xs.shape
    d_model = w_qkv.shape[0] // 3
    ws = w_qkv.reshape(3, d_model, d_in)      # free reshape of the concat weight
    bs = b_qkv.reshape(3, 1, d_model)
    tn = _pick_tile(n, tile_n)
    return pl.pallas_call(
        _stacked_qkv_kernel,
        grid=(3, n // tn),
        in_specs=[
            pl.BlockSpec((1, tn, d_in), lambda g, i: (g, i, 0)),
            pl.BlockSpec((1, d_model, d_in), lambda g, i: (g, 0, 0)),
            pl.BlockSpec((1, 1, d_model), lambda g, i: (g, 0, 0)),
        ],
        out_specs=pl.BlockSpec((1, tn, d_model), lambda g, i: (g, i, 0)),
        out_shape=jax.ShapeDtypeStruct((3, n, d_model), jnp.bfloat16),
        compiler_params=pltpu.CompilerParams(
            dimension_semantics=("parallel", "parallel"),
            vmem_limit_bytes=_VMEM_LIMIT,
        ),
    )(xs, ws, bs)


def _out_proj_kernel(x_ref, w_ref, b_ref, o_ref):
    y = lax.dot_general(x_ref[...], w_ref[...], (((1,), (1,)), ((), ())),
                        preferred_element_type=jnp.float32)
    o_ref[...] = (y + b_ref[...]).astype(o_ref.dtype)


def output_projection(x, w, b, tile_n=512):
    """x: (N, d_model) bf16, w: (d_model, d_model) bf16 -> (N, d_model) f32."""
    n, d_in = x.shape
    d_out = w.shape[0]
    tn = _pick_tile(n, tile_n)
    return pl.pallas_call(
        _out_proj_kernel,
        grid=(n // tn,),
        in_specs=[
            pl.BlockSpec((tn, d_in), lambda i: (i, 0)),
            pl.BlockSpec((d_out, d_in), lambda i: (0, 0)),
            pl.BlockSpec((1, d_out), lambda i: (0, 0)),
        ],
        out_specs=pl.BlockSpec((tn, d_out), lambda i: (i, 0)),
        out_shape=jax.ShapeDtypeStruct((n, d_out), jnp.float32),
        compiler_params=pltpu.CompilerParams(
            dimension_semantics=("parallel",),
            vmem_limit_bytes=_VMEM_LIMIT,
        ),
    )(x, w, b)


# ----------------------------- flash attention ------------------------------

def _make_flash_kernel(heads_in_group, d_k):
    def kernel(q_ref, k_ref, v_ref, o_ref, m_ref, l_ref, acc_ref):
        ki = pl.program_id(3)

        @pl.when(ki == 0)
        def _():
            m_ref[...] = jnp.full_like(m_ref, -jnp.inf)
            l_ref[...] = jnp.zeros_like(l_ref)
            acc_ref[...] = jnp.zeros_like(acc_ref)

        q = q_ref[0, 0]          # (tq,  g*d_k) bf16, 1/sqrt(d_k) already folded in
        k = k_ref[0, 0]          # (tkv, g*d_k) bf16
        v = v_ref[0, 0]          # (tkv, g*d_k) bf16

        # Small static unroll over the heads in this 128-lane group (<= 128/d_k);
        # per-head intermediates are only (tq, tkv) tiles, so live ranges stay
        # bounded (unlike the old all-heads/(S,S) unroll).
        for hd in range(heads_in_group):
            lo = hd * d_k
            qh = q[:, lo:lo + d_k]
            kh = k[:, lo:lo + d_k]
            vh = v[:, lo:lo + d_k]
            # scores = q @ k^T without explicit transpose (contract last dims).
            s = lax.dot_general(qh, kh, (((1,), (1,)), ((), ())),
                                preferred_element_type=jnp.float32)
            m_prev = m_ref[hd]
            m_new = jnp.maximum(m_prev, jnp.max(s, axis=-1, keepdims=True))
            alpha = jnp.exp(m_prev - m_new)
            p = jnp.exp(s - m_new)
            l_ref[hd] = alpha * l_ref[hd] + jnp.sum(p, axis=-1, keepdims=True)
            acc_ref[hd] = alpha * acc_ref[hd] + jnp.dot(
                p.astype(jnp.bfloat16), vh, preferred_element_type=jnp.float32)
            m_ref[hd] = m_new

        @pl.when(ki == pl.num_programs(3) - 1)
        def _():
            # approx reciprocal (EUP slot); error << bf16 output rounding.
            parts = [acc_ref[hd] * pl.reciprocal(l_ref[hd], approx=True)
                     for hd in range(heads_in_group)]
            ctx = parts[0] if heads_in_group == 1 else jnp.concatenate(parts, axis=-1)
            o_ref[0] = ctx.astype(o_ref.dtype)   # single lane-dense store

    return kernel


def flash_sdpa(qkv, batch, seq, d_model, num_heads, tq=256, tkv=256):
    """Flash-style scaled dot-product attention.

    qkv: stacked (3, B, S, d_model) bf16 (q already scaled by 1/sqrt(d_k)).
    Returns the context in (B, S, d_model) bf16 — heads never leave the lane
    dimension, so no transposes anywhere.
    """
    d_k = d_model // num_heads
    g = _heads_per_group(num_heads, d_k, d_model)
    gw = g * d_k
    n_groups = num_heads // g
    tq = _pick_tile(seq, tq)
    tkv = _pick_tile(seq, tkv)
    grid = (batch, n_groups, seq // tq, seq // tkv)

    q_spec = pl.BlockSpec((1, 1, tq, gw), lambda b, hg, qi, ki: (0, b, qi, hg))
    k_spec = pl.BlockSpec((1, 1, tkv, gw), lambda b, hg, qi, ki: (1, b, ki, hg))
    v_spec = pl.BlockSpec((1, 1, tkv, gw), lambda b, hg, qi, ki: (2, b, ki, hg))
    o_spec = pl.BlockSpec((1, tq, gw), lambda b, hg, qi, ki: (b, qi, hg))

    return pl.pallas_call(
        _make_flash_kernel(g, d_k),
        grid=grid,
        in_specs=[q_spec, k_spec, v_spec],
        out_specs=o_spec,
        out_shape=jax.ShapeDtypeStruct((batch, seq, d_model), jnp.bfloat16),
        scratch_shapes=[
            pltpu.VMEM((g, tq, 1), jnp.float32),    # running max
            pltpu.VMEM((g, tq, 1), jnp.float32),    # running denom
            pltpu.VMEM((g, tq, d_k), jnp.float32),  # context accumulator
        ],
        compiler_params=pltpu.CompilerParams(
            dimension_semantics=("parallel", "parallel", "parallel", "arbitrary"),
            vmem_limit_bytes=_VMEM_LIMIT,
        ),
    )(qkv, qkv, qkv)


# ------------------------------ module wrapper ------------------------------

def prepare_params(params, h):
    """One-time parameter prep: concat QKV weights, fold 1/sqrt(d_k), cast bf16."""
    d_model = params["wq"].shape[0]
    assert d_model % h == 0, "d_model must be divisible by the number of heads"
    d_k = d_model // h
    scale = 1.0 / math.sqrt(d_k)
    w_qkv = jnp.concatenate(
        [params["wq"] * scale, params["wk"], params["wv"]], axis=0)
    b_qkv = jnp.concatenate(
        [params["bq"] * scale, params["bk"], params["bv"]], axis=0)
    return {
        "w_qkv": w_qkv.astype(jnp.bfloat16),                 # (3*d_model, d_model)
        "b_qkv": b_qkv.astype(jnp.float32).reshape(1, 3 * d_model),
        "wo": params["wo"].astype(jnp.bfloat16),
        "bo": params["bo"].astype(jnp.float32).reshape(1, d_model),
    }


def multi_headed_attention(prepared, query, key, value, h):
    """General forward (distinct query/key/value), eval mode, mask=None."""
    b, s, d_model = query.shape
    n = b * s
    xs = jnp.stack([query.astype(jnp.bfloat16),
                    key.astype(jnp.bfloat16),
                    value.astype(jnp.bfloat16)]).reshape(3, n, d_model)
    qkv = stacked_qkv_projection(xs, prepared["w_qkv"], prepared["b_qkv"])
    ctx = flash_sdpa(qkv.reshape(3, b, s, d_model), b, s, d_model, h)
    out = output_projection(ctx.reshape(n, d_model), prepared["wo"], prepared["bo"])
    return out.reshape(b, s, d_model)


def multi_headed_self_attention(prepared, x, h):
    """Self-attention fast path (query is key is value): one fused QKV matmul."""
    b, s, d_model = x.shape
    n = b * s
    xb = x.reshape(n, d_model).astype(jnp.bfloat16)
    qkv = fused_qkv_projection(xb, prepared["w_qkv"], prepared["b_qkv"])
    ctx = flash_sdpa(qkv.reshape(3, b, s, d_model), b, s, d_model, h)
    out = output_projection(ctx.reshape(n, d_model), prepared["wo"], prepared["bo"])
    return out.reshape(b, s, d_model)


# pure-JAX f32 reference (matches the PyTorch module's eval-mode forward)
def _reference(params, query, key, value, h):
    b, s, d_model = query.shape
    d_k = d_model // h

    def proj(x, w, bias):
        y = x.reshape(b * s, d_model) @ w.T + bias
        return y.reshape(b, s, h, d_k).transpose(0, 2, 1, 3)

    q = proj(query, params["wq"], params["bq"])
    k = proj(key, params["wk"], params["bk"])
    v = proj(value, params["wv"], params["bv"])
    scores = jnp.einsum("bhqd,bhkd->bhqk", q, k) / math.sqrt(d_k)
    p = jax.nn.softmax(scores, axis=-1)
    x = jnp.einsum("bhqk,bhkd->bhqd", p, v)
    x = x.transpose(0, 2, 1, 3).reshape(b * s, d_model)
    out = (x @ params["wo"].T + params["bo"]).reshape(b, s, d_model)
    return out, p


# ----------------------------------- main -----------------------------------

if __name__ == "__main__":
    B, S, d_model, h = 2, 8, 32, 4

    key0 = jax.random.PRNGKey(0)
    keys = jax.random.split(key0, 12)

    bound = 1.0 / math.sqrt(d_model)

    def init_w(k):
        return jax.random.uniform(k, (d_model, d_model), jnp.float32, -bound, bound)

    def init_b(k):
        return jax.random.uniform(k, (d_model,), jnp.float32, -bound, bound)

    params = {
        "wq": init_w(keys[0]), "bq": init_b(keys[1]),
        "wk": init_w(keys[2]), "bk": init_b(keys[3]),
        "wv": init_w(keys[4]), "bv": init_b(keys[5]),
        "wo": init_w(keys[6]), "bo": init_b(keys[7]),
    }
    prepared = prepare_params(params, h)

    query = jax.random.normal(keys[8], (B, S, d_model), jnp.float32)
    key_in = jax.random.normal(keys[9], (B, S, d_model), jnp.float32)
    value = jax.random.normal(keys[10], (B, S, d_model), jnp.float32)

    mha = jax.jit(multi_headed_attention, static_argnames=("h",))
    self_mha = jax.jit(multi_headed_self_attention, static_argnames=("h",))

    out = jax.block_until_ready(mha(prepared, query, key_in, value, h=h))
    out_self = jax.block_until_ready(self_mha(prepared, query, h=h))

    ref_out, _ = _reference(params, query, key_in, value, h)
    ref_self, _ = _reference(params, query, query, query, h)

    assert out.shape == (B, S, d_model)
    assert out_self.shape == (B, S, d_model)
    # bf16 matmul operands + approx reciprocal => loosened tolerances vs f32 ref.
    assert jnp.allclose(out, ref_out, atol=5e-2, rtol=5e-2)
    assert jnp.allclose(out_self, ref_self, atol=5e-2, rtol=5e-2)

    print("KERNEL_OK")
</pallas_src>

<mosaic_0001>
module attributes {stable_mosaic.version = 11 : i64} {
  func.func @kernel(%arg0: i32, %arg1: i32, %arg2: i32, %arg3: i32, %arg4: memref<1x1x8x32xbf16, #tpu.memory_space<vmem>>, %arg5: memref<1x1x8x32xbf16, #tpu.memory_space<vmem>>, %arg6: memref<1x1x8x32xbf16, #tpu.memory_space<vmem>>, %arg7: memref<1x8x32xbf16, #tpu.memory_space<vmem>>, %arg8: memref<4x8x1xf32, #tpu.memory_space<vmem>>, %arg9: memref<4x8x1xf32, #tpu.memory_space<vmem>>, %arg10: memref<4x8x8xf32, #tpu.memory_space<vmem>>) attributes {dimension_semantics = [#tpu.dimension_semantics<parallel>, #tpu.dimension_semantics<parallel>, #tpu.dimension_semantics<parallel>, #tpu.dimension_semantics<arbitrary>], iteration_bounds = array<i64: 2, 1, 1, 1>, scalar_prefetch = 0 : i64, scratch_operands = 3 : i64, tpu.core_type = #tpu.core_type<tc>, window_params = [{transform_indices = @transform_0, window_bounds = array<i64: 1, 1, 8, 32>}, {transform_indices = @transform_1, window_bounds = array<i64: 1, 1, 8, 32>}, {transform_indices = @transform_2, window_bounds = array<i64: 1, 1, 8, 32>}, {transform_indices = @transform_3, window_bounds = array<i64: 1, 8, 32>}]} {
    %c0_i32 = arith.constant 0 : i32
    %0 = arith.cmpi eq, %arg3, %c0_i32 : i32
    %1 = arith.extui %0 : i1 to i32
    %c0_i32_0 = arith.constant 0 : i32
    %2 = arith.cmpi ne, %1, %c0_i32_0 : i32
    scf.if %2 {
      %cst_98 = arith.constant 0xFF800000 : f32
      %156 = vector.broadcast %cst_98 : f32 to vector<4x8x1xf32>
      %c0_99 = arith.constant 0 : index
      %c0_100 = arith.constant 0 : index
      %c0_101 = arith.constant 0 : index
      %157 = vector.load %arg8[%c0_99, %c0_100, %c0_101] : memref<4x8x1xf32, #tpu.memory_space<vmem>>, vector<4x8x1xf32>
      tpu.vector_store %arg8[%c0_99, %c0_100, %c0_101], %156 {strides = array<i32>} : memref<4x8x1xf32, #tpu.memory_space<vmem>>, vector<4x8x1xf32>,
      %cst_102 = arith.constant 0.000000e+00 : f32
      %158 = vector.broadcast %cst_102 : f32 to vector<4x8x1xf32>
      %c0_103 = arith.constant 0 : index
      %c0_104 = arith.constant 0 : index
      %c0_105 = arith.constant 0 : index
      %159 = vector.load %arg9[%c0_103, %c0_104, %c0_105] : memref<4x8x1xf32, #tpu.memory_space<vmem>>, vector<4x8x1xf32>
      tpu.vector_store %arg9[%c0_103, %c0_104, %c0_105], %158 {strides = array<i32>} : memref<4x8x1xf32, #tpu.memory_space<vmem>>, vector<4x8x1xf32>,
      %cst_106 = arith.constant 0.000000e+00 : f32
      %160 = vector.broadcast %cst_106 : f32 to vector<4x8x8xf32>
      %c0_107 = arith.constant 0 : index
      %c0_108 = arith.constant 0 : index
      %c0_109 = arith.constant 0 : index
      %161 = vector.load %arg10[%c0_107, %c0_108, %c0_109] : memref<4x8x8xf32, #tpu.memory_space<vmem>>, vector<4x8x8xf32>
      tpu.vector_store %arg10[%c0_107, %c0_108, %c0_109], %160 {strides = array<i32>} : memref<4x8x8xf32, #tpu.memory_space<vmem>>, vector<4x8x8xf32>,
    } else {
    }
    %c0 = arith.constant 0 : index
    %c0_1 = arith.constant 0 : index
    %c0_2 = arith.constant 0 : index
    %c0_3 = arith.constant 0 : index
    %3 = vector.load %arg4[%c0, %c0_1, %c0_2, %c0_3] : memref<1x1x8x32xbf16, #tpu.memory_space<vmem>>, vector<1x1x8x32xbf16>
    %4 = vector.shape_cast %3 : vector<1x1x8x32xbf16> to vector<8x32xbf16>
    %c0_4 = arith.constant 0 : index
    %c0_5 = arith.constant 0 : index
    %c0_6 = arith.constant 0 : index
    %c0_7 = arith.constant 0 : index
    %5 = vector.load %arg5[%c0_4, %c0_5, %c0_6, %c0_7] : memref<1x1x8x32xbf16, #tpu.memory_space<vmem>>, vector<1x1x8x32xbf16>
    %6 = vector.shape_cast %5 : vector<1x1x8x32xbf16> to vector<8x32xbf16>
    %c0_8 = arith.constant 0 : index
    %c0_9 = arith.constant 0 : index
    %c0_10 = arith.constant 0 : index
    %c0_11 = arith.constant 0 : index
    %7 = vector.load %arg6[%c0_8, %c0_9, %c0_10, %c0_11] : memref<1x1x8x32xbf16, #tpu.memory_space<vmem>>, vector<1x1x8x32xbf16>
    %8 = vector.shape_cast %7 : vector<1x1x8x32xbf16> to vector<8x32xbf16>
    %9 = vector.extract_strided_slice %4 {offsets = [0, 0], sizes = [8, 8], strides = [1, 1]} : vector<8x32xbf16> to vector<8x8xbf16>
    %10 = vector.extract_strided_slice %6 {offsets = [0, 0], sizes = [8, 8], strides = [1, 1]} : vector<8x32xbf16> to vector<8x8xbf16>
    %11 = vector.extract_strided_slice %8 {offsets = [0, 0], sizes = [8, 8], strides = [1, 1]} : vector<8x32xbf16> to vector<8x8xbf16>
    %cst = arith.constant dense<0.000000e+00> : vector<8x8xf32>
    %12 = tpu.matmul %9, %10, %cst {dimension_numbers = #tpu.dot_dimension_numbers<[1], [1], [0], [0], [0, 0, 1, 0], [], []>} : vector<8x8xbf16>, vector<8x8xbf16>, vector<8x8xf32> -> vector<8x8xf32>
    %c0_12 = arith.constant 0 : index
    %c0_13 = arith.constant 0 : index
    %c0_14 = arith.constant 0 : index
    %13 = vector.load %arg8[%c0_12, %c0_13, %c0_14] : memref<4x8x1xf32, #tpu.memory_space<vmem>>, vector<1x8x1xf32>
    %14 = vector.shape_cast %13 : vector<1x8x1xf32> to vector<8x1xf32>
    %cst_15 = arith.constant dense<0xFF800000> : vector<8xf32>
    %15 = vector.multi_reduction <maximumf>, %12, %cst_15 [1] : vector<8x8xf32> to vector<8xf32>
    %16 = vector.shape_cast %15 : vector<8xf32> to vector<8x1xf32>
    %17 = arith.maximumf %14, %16 : vector<8x1xf32>
    %18 = arith.subf %14, %17 : vector<8x1xf32>
    %19 = math.exp %18 : vector<8x1xf32>
    %20 = vector.broadcast %17 : vector<8x1xf32> to vector<8x8xf32>
    %21 = arith.subf %12, %20 : vector<8x8xf32>
    %22 = math.exp %21 : vector<8x8xf32>
    %c0_16 = arith.constant 0 : index
    %c0_17 = arith.constant 0 : index
    %c0_18 = arith.constant 0 : index
    %23 = vector.load %arg9[%c0_16, %c0_17, %c0_18] : memref<4x8x1xf32, #tpu.memory_space<vmem>>, vector<1x8x1xf32>
    %24 = vector.shape_cast %23 : vector<1x8x1xf32> to vector<8x1xf32>
    %25 = arith.mulf %19, %24 : vector<8x1xf32>
    %cst_19 = arith.constant dense<0.000000e+00> : vector<8xf32>
    %26 = vector.multi_reduction <add>, %22, %cst_19 [1] : vector<8x8xf32> to vector<8xf32>
    %27 = vector.shape_cast %26 : vector<8xf32> to vector<8x1xf32>
    %28 = arith.addf %25, %27 : vector<8x1xf32>
    %c0_20 = arith.constant 0 : index
    %c0_21 = arith.constant 0 : index
    %c0_22 = arith.constant 0 : index
    %29 = vector.load %arg9[%c0_20, %c0_21, %c0_22] : memref<4x8x1xf32, #tpu.memory_space<vmem>>, vector<1x8x1xf32>
    %30 = vector.shape_cast %29 : vector<1x8x1xf32> to vector<8x1xf32>
    %31 = vector.shape_cast %28 : vector<8x1xf32> to vector<1x8x1xf32>
    tpu.vector_store %arg9[%c0_20, %c0_21, %c0_22], %31 {strides = array<i32>} : memref<4x8x1xf32, #tpu.memory_space<vmem>>, vector<1x8x1xf32>,
    %c0_23 = arith.constant 0 : index
    %c0_24 = arith.constant 0 : index
    %c0_25 = arith.constant 0 : index
    %32 = vector.load %arg10[%c0_23, %c0_24, %c0_25] : memref<4x8x8xf32, #tpu.memory_space<vmem>>, vector<1x8x8xf32>
    %33 = vector.shape_cast %32 : vector<1x8x8xf32> to vector<8x8xf32>
    %34 = vector.broadcast %19 : vector<8x1xf32> to vector<8x8xf32>
    %35 = arith.mulf %34, %33 : vector<8x8xf32>
    %36 = arith.truncf %22 : vector<8x8xf32> to vector<8x8xbf16>
    %cst_26 = arith.constant dense<0.000000e+00> : vector<8x8xf32>
    %37 = tpu.matmul %36, %11, %cst_26 {dimension_numbers = #tpu.dot_dimension_numbers<[1], [0], [0], [1], [0, 0, 1, 1], [], []>} : vector<8x8xbf16>, vector<8x8xbf16>, vector<8x8xf32> -> vector<8x8xf32>
    %38 = arith.addf %35, %37 : vector<8x8xf32>
    %c0_27 = arith.constant 0 : index
    %c0_28 = arith.constant 0 : index
    %c0_29 = arith.constant 0 : index
    %39 = vector.load %arg10[%c0_27, %c0_28, %c0_29] : memref<4x8x8xf32, #tpu.memory_space<vmem>>, vector<1x8x8xf32>
    %40 = vector.shape_cast %39 : vector<1x8x8xf32> to vector<8x8xf32>
    %41 = vector.shape_cast %38 : vector<8x8xf32> to vector<1x8x8xf32>
    tpu.vector_store %arg10[%c0_27, %c0_28, %c0_29], %41 {strides = array<i32>} : memref<4x8x8xf32, #tpu.memory_space<vmem>>, vector<1x8x8xf32>,
    %c0_30 = arith.constant 0 : index
    %c0_31 = arith.constant 0 : index
    %c0_32 = arith.constant 0 : index
    %42 = vector.load %arg8[%c0_30, %c0_31, %c0_32] : memref<4x8x1xf32, #tpu.memory_space<vmem>>, vector<1x8x1xf32>
    %43 = vector.shape_cast %42 : vector<1x8x1xf32> to vector<8x1xf32>
    %44 = vector.shape_cast %17 : vector<8x1xf32> to vector<1x8x1xf32>
    tpu.vector_store %arg8[%c0_30, %c0_31, %c0_32], %44 {strides = array<i32>} : memref<4x8x1xf32, #tpu.memory_space<vmem>>, vector<1x8x1xf32>,
    %45 = vector.extract_strided_slice %4 {offsets = [0, 8], sizes = [8, 8], strides = [1, 1]} : vector<8x32xbf16> to vector<8x8xbf16>
    %46 = vector.extract_strided_slice %6 {offsets = [0, 8], sizes = [8, 8], strides = [1, 1]} : vector<8x32xbf16> to vector<8x8xbf16>
    %47 = vector.extract_strided_slice %8 {offsets = [0, 8], sizes = [8, 8], strides = [1, 1]} : vector<8x32xbf16> to vector<8x8xbf16>
    %cst_33 = arith.constant dense<0.000000e+00> : vector<8x8xf32>
    %48 = tpu.matmul %45, %46, %cst_33 {dimension_numbers = #tpu.dot_dimension_numbers<[1], [1], [0], [0], [0, 0, 1, 0], [], []>} : vector<8x8xbf16>, vector<8x8xbf16>, vector<8x8xf32> -> vector<8x8xf32>
    %c1 = arith.constant 1 : index
    %c0_34 = arith.constant 0 : index
    %c0_35 = arith.constant 0 : index
    %49 = vector.load %arg8[%c1, %c0_34, %c0_35] : memref<4x8x1xf32, #tpu.memory_space<vmem>>, vector<1x8x1xf32>
    %50 = vector.shape_cast %49 : vector<1x8x1xf32> to vector<8x1xf32>
    %cst_36 = arith.constant dense<0xFF800000> : vector<8xf32>
    %51 = vector.multi_reduction <maximumf>, %48, %cst_36 [1] : vector<8x8xf32> to vector<8xf32>
    %52 = vector.shape_cast %51 : vector<8xf32> to vector<8x1xf32>
    %53 = arith.maximumf %50, %52 : vector<8x1xf32>
    %54 = arith.subf %50, %53 : vector<8x1xf32>
    %55 = math.exp %54 : vector<8x1xf32>
    %56 = vector.broadcast %53 : vector<8x1xf32> to vector<8x8xf32>
    %57 = arith.subf %48, %56 : vector<8x8xf32>
    %58 = math.exp %57 : vector<8x8xf32>
    %c1_37 = arith.constant 1 : index
    %c0_38 = arith.constant 0 : index
    %c0_39 = arith.constant 0 : index
    %59 = vector.load %arg9[%c1_37, %c0_38, %c0_39] : memref<4x8x1xf32, #tpu.memory_space<vmem>>, vector<1x8x1xf32>
    %60 = vector.shape_cast %59 : vector<1x8x1xf32> to vector<8x1xf32>
    %61 = arith.mulf %55, %60 : vector<8x1xf32>
    %cst_40 = arith.constant dense<0.000000e+00> : vector<8xf32>
    %62 = vector.multi_reduction <add>, %58, %cst_40 [1] : vector<8x8xf32> to vector<8xf32>
    %63 = vector.shape_cast %62 : vector<8xf32> to vector<8x1xf32>
    %64 = arith.addf %61, %63 : vector<8x1xf32>
    %c1_41 = arith.constant 1 : index
    %c0_42 = arith.constant 0 : index
    %c0_43 = arith.constant 0 : index
    %65 = vector.load %arg9[%c1_41, %c0_42, %c0_43] : memref<4x8x1xf32, #tpu.memory_space<vmem>>, vector<1x8x1xf32>
    %66 = vector.shape_cast %65 : vector<1x8x1xf32> to vector<8x1xf32>
    %67 = vector.shape_cast %64 : vector<8x1xf32> to vector<1x8x1xf32>
    tpu.vector_store %arg9[%c1_41, %c0_42, %c0_43], %67 {strides = array<i32>} : memref<4x8x1xf32, #tpu.memory_space<vmem>>, vector<1x8x1xf32>,
    %c1_44 = arith.constant 1 : index
    %c0_45 = arith.constant 0 : index
    %c0_46 = arith.constant 0 : index
    %68 = vector.load %arg10[%c1_44, %c0_45, %c0_46] : memref<4x8x8xf32, #tpu.memory_space<vmem>>, vector<1x8x8xf32>
    %69 = vector.shape_cast %68 : vector<1x8x8xf32> to vector<8x8xf32>
    %70 = vector.broadcast %55 : vector<8x1xf32> to vector<8x8xf32>
    %71 = arith.mulf %70, %69 : vector<8x8xf32>
    %72 = arith.truncf %58 : vector<8x8xf32> to vector<8x8xbf16>
    %cst_47 = arith.constant dense<0.000000e+00> : vector<8x8xf32>
    %73 = tpu.matmul %72, %47, %cst_47 {dimension_numbers = #tpu.dot_dimension_numbers<[1], [0], [0], [1], [0, 0, 1, 1], [], []>} : vector<8x8xbf16>, vector<8x8xbf16>, vector<8x8xf32> -> vector<8x8xf32>
    %74 = arith.addf %71, %73 : vector<8x8xf32>
    %c1_48 = arith.constant 1 : index
    %c0_49 = arith.constant 0 : index
    %c0_50 = arith.constant 0 : index
    %75 = vector.load %arg10[%c1_48, %c0_49, %c0_50] : memref<4x8x8xf32, #tpu.memory_space<vmem>>, vector<1x8x8xf32>
    %76 = vector.shape_cast %75 : vector<1x8x8xf32> to vector<8x8xf32>
    %77 = vector.shape_cast %74 : vector<8x8xf32> to vector<1x8x8xf32>
    tpu.vector_store %arg10[%c1_48, %c0_49, %c0_50], %77 {strides = array<i32>} : memref<4x8x8xf32, #tpu.memory_space<vmem>>, vector<1x8x8xf32>,
    %c1_51 = arith.constant 1 : index
    %c0_52 = arith.constant 0 : index
    %c0_53 = arith.constant 0 : index
    %78 = vector.load %arg8[%c1_51, %c0_52, %c0_53] : memref<4x8x1xf32, #tpu.memory_space<vmem>>, vector<1x8x1xf32>
    %79 = vector.shape_cast %78 : vector<1x8x1xf32> to vector<8x1xf32>
    %80 = vector.shape_cast %53 : vector<8x1xf32> to vector<1x8x1xf32>
    tpu.vector_store %arg8[%c1_51, %c0_52, %c0_53], %80 {strides = array<i32>} : memref<4x8x1xf32, #tpu.memory_space<vmem>>, vector<1x8x1xf32>,
    %81 = vector.extract_strided_slice %4 {offsets = [0, 16], sizes = [8, 8], strides = [1, 1]} : vector<8x32xbf16> to vector<8x8xbf16>
    %82 = vector.extract_strided_slice %6 {offsets = [0, 16], sizes = [8, 8], strides = [1, 1]} : vector<8x32xbf16> to vector<8x8xbf16>
    %83 = vector.extract_strided_slice %8 {offsets = [0, 16], sizes = [8, 8], strides = [1, 1]} : vector<8x32xbf16> to vector<8x8xbf16>
    %cst_54 = arith.constant dense<0.000000e+00> : vector<8x8xf32>
    %84 = tpu.matmul %81, %82, %cst_54 {dimension_numbers = #tpu.dot_dimension_numbers<[1], [1], [0], [0], [0, 0, 1, 0], [], []>} : vector<8x8xbf16>, vector<8x8xbf16>, vector<8x8xf32> -> vector<8x8xf32>
    %c2 = arith.constant 2 : index
    %c0_55 = arith.constant 0 : index
    %c0_56 = arith.constant 0 : index
    %85 = vector.load %arg8[%c2, %c0_55, %c0_56] : memref<4x8x1xf32, #tpu.memory_space<vmem>>, vector<1x8x1xf32>
    %86 = vector.shape_cast %85 : vector<1x8x1xf32> to vector<8x1xf32>
    %cst_57 = arith.constant dense<0xFF800000> : vector<8xf32>
    %87 = vector.multi_reduction <maximumf>, %84, %cst_57 [1] : vector<8x8xf32> to vector<8xf32>
    %88 = vector.shape_cast %87 : vector<8xf32> to vector<8x1xf32>
    %89 = arith.maximumf %86, %88 : vector<8x1xf32>
    %90 = arith.subf %86, %89 : vector<8x1xf32>
    %91 = math.exp %90 : vector<8x1xf32>
    %92 = vector.broadcast %89 : vector<8x1xf32> to vector<8x8xf32>
    %93 = arith.subf %84, %92 : vector<8x8xf32>
    %94 = math.exp %93 : vector<8x8xf32>
    %c2_58 = arith.constant 2 : index
    %c0_59 = arith.constant 0 : index
    %c0_60 = arith.constant 0 : index
    %95 = vector.load %arg9[%c2_58, %c0_59, %c0_60] : memref<4x8x1xf32, #tpu.memory_space<vmem>>, vector<1x8x1xf32>
    %96 = vector.shape_cast %95 : vector<1x8x1xf32> to vector<8x1xf32>
    %97 = arith.mulf %91, %96 : vector<8x1xf32>
    %cst_61 = arith.constant dense<0.000000e+00> : vector<8xf32>
    %98 = vector.multi_reduction <add>, %94, %cst_61 [1] : vector<8x8xf32> to vector<8xf32>
    %99 = vector.shape_cast %98 : vector<8xf32> to vector<8x1xf32>
    %100 = arith.addf %97, %99 : vector<8x1xf32>
    %c2_62 = arith.constant 2 : index
    %c0_63 = arith.constant 0 : index
    %c0_64 = arith.constant 0 : index
    %101 = vector.load %arg9[%c2_62, %c0_63, %c0_64] : memref<4x8x1xf32, #tpu.memory_space<vmem>>, vector<1x8x1xf32>
    %102 = vector.shape_cast %101 : vector<1x8x1xf32> to vector<8x1xf32>
    %103 = vector.shape_cast %100 : vector<8x1xf32> to vector<1x8x1xf32>
    tpu.vector_store %arg9[%c2_62, %c0_63, %c0_64], %103 {strides = array<i32>} : memref<4x8x1xf32, #tpu.memory_space<vmem>>, vector<1x8x1xf32>,
    %c2_65 = arith.constant 2 : index
    %c0_66 = arith.constant 0 : index
    %c0_67 = arith.constant 0 : index
    %104 = vector.load %arg10[%c2_65, %c0_66, %c0_67] : memref<4x8x8xf32, #tpu.memory_space<vmem>>, vector<1x8x8xf32>
    %105 = vector.shape_cast %104 : vector<1x8x8xf32> to vector<8x8xf32>
    %106 = vector.broadcast %91 : vector<8x1xf32> to vector<8x8xf32>
    %107 = arith.mulf %106, %105 : vector<8x8xf32>
    %108 = arith.truncf %94 : vector<8x8xf32> to vector<8x8xbf16>
    %cst_68 = arith.constant dense<0.000000e+00> : vector<8x8xf32>
    %109 = tpu.matmul %108, %83, %cst_68 {dimension_numbers = #tpu.dot_dimension_numbers<[1], [0], [0], [1], [0, 0, 1, 1], [], []>} : vector<8x8xbf16>, vector<8x8xbf16>, vector<8x8xf32> -> vector<8x8xf32>
    %110 = arith.addf %107, %109 : vector<8x8xf32>
    %c2_69 = arith.constant 2 : index
    %c0_70 = arith.constant 0 : index
    %c0_71 = arith.constant 0 : index
    %111 = vector.load %arg10[%c2_69, %c0_70, %c0_71] : memref<4x8x8xf32, #tpu.memory_space<vmem>>, vector<1x8x8xf32>
    %112 = vector.shape_cast %111 : vector<1x8x8xf32> to vector<8x8xf32>
    %113 = vector.shape_cast %110 : vector<8x8xf32> to vector<1x8x8xf32>
    tpu.vector_store %arg10[%c2_69, %c0_70, %c0_71], %113 {strides = array<i32>} : memref<4x8x8xf32, #tpu.memory_space<vmem>>, vector<1x8x8xf32>,
    %c2_72 = arith.constant 2 : index
    %c0_73 = arith.constant 0 : index
    %c0_74 = arith.constant 0 : index
    %114 = vector.load %arg8[%c2_72, %c0_73, %c0_74] : memref<4x8x1xf32, #tpu.memory_space<vmem>>, vector<1x8x1xf32>
    %115 = vector.shape_cast %114 : vector<1x8x1xf32> to vector<8x1xf32>
    %116 = vector.shape_cast %89 : vector<8x1xf32> to vector<1x8x1xf32>
    tpu.vector_store %arg8[%c2_72, %c0_73, %c0_74], %116 {strides = array<i32>} : memref<4x8x1xf32, #tpu.memory_space<vmem>>, vector<1x8x1xf32>,
    %117 = vector.extract_strided_slice %4 {offsets = [0, 24], sizes = [8, 8], strides = [1, 1]} : vector<8x32xbf16> to vector<8x8xbf16>
    %118 = vector.extract_strided_slice %6 {offsets = [0, 24], sizes = [8, 8], strides = [1, 1]} : vector<8x32xbf16> to vector<8x8xbf16>
    %119 = vector.extract_strided_slice %8 {offsets = [0, 24], sizes = [8, 8], strides = [1, 1]} : vector<8x32xbf16> to vector<8x8xbf16>
    %cst_75 = arith.constant dense<0.000000e+00> : vector<8x8xf32>
    %120 = tpu.matmul %117, %118, %cst_75 {dimension_numbers = #tpu.dot_dimension_numbers<[1], [1], [0], [0], [0, 0, 1, 0], [], []>} : vector<8x8xbf16>, vector<8x8xbf16>, vector<8x8xf32> -> vector<8x8xf32>
    %c3 = arith.constant 3 : index
    %c0_76 = arith.constant 0 : index
    %c0_77 = arith.constant 0 : index
    %121 = vector.load %arg8[%c3, %c0_76, %c0_77] : memref<4x8x1xf32, #tpu.memory_space<vmem>>, vector<1x8x1xf32>
    %122 = vector.shape_cast %121 : vector<1x8x1xf32> to vector<8x1xf32>
    %cst_78 = arith.constant dense<0xFF800000> : vector<8xf32>
    %123 = vector.multi_reduction <maximumf>, %120, %cst_78 [1] : vector<8x8xf32> to vector<8xf32>
    %124 = vector.shape_cast %123 : vector<8xf32> to vector<8x1xf32>
    %125 = arith.maximumf %122, %124 : vector<8x1xf32>
    %126 = arith.subf %122, %125 : vector<8x1xf32>
    %127 = math.exp %126 : vector<8x1xf32>
    %128 = vector.broadcast %125 : vector<8x1xf32> to vector<8x8xf32>
    %129 = arith.subf %120, %128 : vector<8x8xf32>
    %130 = math.exp %129 : vector<8x8xf32>
    %c3_79 = arith.constant 3 : index
    %c0_80 = arith.constant 0 : index
    %c0_81 = arith.constant 0 : index
    %131 = vector.load %arg9[%c3_79, %c0_80, %c0_81] : memref<4x8x1xf32, #tpu.memory_space<vmem>>, vector<1x8x1xf32>
    %132 = vector.shape_cast %131 : vector<1x8x1xf32> to vector<8x1xf32>
    %133 = arith.mulf %127, %132 : vector<8x1xf32>
    %cst_82 = arith.constant dense<0.000000e+00> : vector<8xf32>
    %134 = vector.multi_reduction <add>, %130, %cst_82 [1] : vector<8x8xf32> to vector<8xf32>
    %135 = vector.shape_cast %134 : vector<8xf32> to vector<8x1xf32>
    %136 = arith.addf %133, %135 : vector<8x1xf32>
    %c3_83 = arith.constant 3 : index
    %c0_84 = arith.constant 0 : index
    %c0_85 = arith.constant 0 : index
    %137 = vector.load %arg9[%c3_83, %c0_84, %c0_85] : memref<4x8x1xf32, #tpu.memory_space<vmem>>, vector<1x8x1xf32>
    %138 = vector.shape_cast %137 : vector<1x8x1xf32> to vector<8x1xf32>
    %139 = vector.shape_cast %136 : vector<8x1xf32> to vector<1x8x1xf32>
    tpu.vector_store %arg9[%c3_83, %c0_84, %c0_85], %139 {strides = array<i32>} : memref<4x8x1xf32, #tpu.memory_space<vmem>>, vector<1x8x1xf32>,
    %c3_86 = arith.constant 3 : index
    %c0_87 = arith.constant 0 : index
    %c0_88 = arith.constant 0 : index
    %140 = vector.load %arg10[%c3_86, %c0_87, %c0_88] : memref<4x8x8xf32, #tpu.memory_space<vmem>>, vector<1x8x8xf32>
    %141 = vector.shape_cast %140 : vector<1x8x8xf32> to vector<8x8xf32>
    %142 = vector.broadcast %127 : vector<8x1xf32> to vector<8x8xf32>
    %143 = arith.mulf %142, %141 : vector<8x8xf32>
    %144 = arith.truncf %130 : vector<8x8xf32> to vector<8x8xbf16>
    %cst_89 = arith.constant dense<0.000000e+00> : vector<8x8xf32>
    %145 = tpu.matmul %144, %119, %cst_89 {dimension_numbers = #tpu.dot_dimension_numbers<[1], [0], [0], [1], [0, 0, 1, 1], [], []>} : vector<8x8xbf16>, vector<8x8xbf16>, vector<8x8xf32> -> vector<8x8xf32>
    %146 = arith.addf %143, %145 : vector<8x8xf32>
    %c3_90 = arith.constant 3 : index
    %c0_91 = arith.constant 0 : index
    %c0_92 = arith.constant 0 : index
    %147 = vector.load %arg10[%c3_90, %c0_91, %c0_92] : memref<4x8x8xf32, #tpu.memory_space<vmem>>, vector<1x8x8xf32>
    %148 = vector.shape_cast %147 : vector<1x8x8xf32> to vector<8x8xf32>
    %149 = vector.shape_cast %146 : vector<8x8xf32> to vector<1x8x8xf32>
    tpu.vector_store %arg10[%c3_90, %c0_91, %c0_92], %149 {strides = array<i32>} : memref<4x8x8xf32, #tpu.memory_space<vmem>>, vector<1x8x8xf32>,
    %c3_93 = arith.constant 3 : index
    %c0_94 = arith.constant 0 : index
    %c0_95 = arith.constant 0 : index
    %150 = vector.load %arg8[%c3_93, %c0_94, %c0_95] : memref<4x8x1xf32, #tpu.memory_space<vmem>>, vector<1x8x1xf32>
    %151 = vector.shape_cast %150 : vector<1x8x1xf32> to vector<8x1xf32>
    %152 = vector.shape_cast %125 : vector<8x1xf32> to vector<1x8x1xf32>
    tpu.vector_store %arg8[%c3_93, %c0_94, %c0_95], %152 {strides = array<i32>} : memref<4x8x1xf32, #tpu.memory_space<vmem>>, vector<1x8x1xf32>,
    %c0_i32_96 = arith.constant 0 : i32
    %153 = arith.cmpi eq, %arg3, %c0_i32_96 : i32
    %154 = arith.extui %153 : i1 to i32
    %c0_i32_97 = arith.constant 0 : i32
    %155 = arith.cmpi ne, %154, %c0_i32_97 : i32
    scf.if %155 {
      %c0_98 = arith.constant 0 : index
      %c0_99 = arith.constant 0 : index
      %c0_100 = arith.constant 0 : index
      %156 = vector.load %arg10[%c0_98, %c0_99, %c0_100] : memref<4x8x8xf32, #tpu.memory_space<vmem>>, vector<1x8x8xf32>
      %157 = vector.shape_cast %156 : vector<1x8x8xf32> to vector<8x8xf32>
      %c0_101 = arith.constant 0 : index
      %c0_102 = arith.constant 0 : index
      %c0_103 = arith.constant 0 : index
      %158 = vector.load %arg9[%c0_101, %c0_102, %c0_103] : memref<4x8x1xf32, #tpu.memory_space<vmem>>, vector<1x8x1xf32>
      %159 = vector.shape_cast %158 : vector<1x8x1xf32> to vector<8x1xf32>
      %160 = tpu.reciprocal %159 {approx = true} : vector<8x1xf32> -> vector<8x1xf32>
      %161 = vector.broadcast %160 : vector<8x1xf32> to vector<8x8xf32>
      %162 = arith.mulf %157, %161 : vector<8x8xf32>
      %c1_104 = arith.constant 1 : index
      %c0_105 = arith.constant 0 : index
      %c0_106 = arith.constant 0 : index
      %163 = vector.load %arg10[%c1_104, %c0_105, %c0_106] : memref<4x8x8xf32, #tpu.memory_space<vmem>>, vector<1x8x8xf32>
      %164 = vector.shape_cast %163 : vector<1x8x8xf32> to vector<8x8xf32>
      %c1_107 = arith.constant 1 : index
      %c0_108 = arith.constant 0 : index
      %c0_109 = arith.constant 0 : index
      %165 = vector.load %arg9[%c1_107, %c0_108, %c0_109] : memref<4x8x1xf32, #tpu.memory_space<vmem>>, vector<1x8x1xf32>
      %166 = vector.shape_cast %165 : vector<1x8x1xf32> to vector<8x1xf32>
      %167 = tpu.reciprocal %166 {approx = true} : vector<8x1xf32> -> vector<8x1xf32>
      %168 = vector.broadcast %167 : vector<8x1xf32> to vector<8x8xf32>
      %169 = arith.mulf %164, %168 : vector<8x8xf32>
      %c2_110 = arith.constant 2 : index
      %c0_111 = arith.constant 0 : index
      %c0_112 = arith.constant 0 : index
      %170 = vector.load %arg10[%c2_110, %c0_111, %c0_112] : memref<4x8x8xf32, #tpu.memory_space<vmem>>, vector<1x8x8xf32>
      %171 = vector.shape_cast %170 : vector<1x8x8xf32> to vector<8x8xf32>
      %c2_113 = arith.constant 2 : index
      %c0_114 = arith.constant 0 : index
      %c0_115 = arith.constant 0 : index
      %172 = vector.load %arg9[%c2_113, %c0_114, %c0_115] : memref<4x8x1xf32, #tpu.memory_space<vmem>>, vector<1x8x1xf32>
      %173 = vector.shape_cast %172 : vector<1x8x1xf32> to vector<8x1xf32>
      %174 = tpu.reciprocal %173 {approx = true} : vector<8x1xf32> -> vector<8x1xf32>
      %175 = vector.broadcast %174 : vector<8x1xf32> to vector<8x8xf32>
      %176 = arith.mulf %171, %175 : vector<8x8xf32>
      %c3_116 = arith.constant 3 : index
      %c0_117 = arith.constant 0 : index
      %c0_118 = arith.constant 0 : index
      %177 = vector.load %arg10[%c3_116, %c0_117, %c0_118] : memref<4x8x8xf32, #tpu.memory_space<vmem>>, vector<1x8x8xf32>
      %178 = vector.shape_cast %177 : vector<1x8x8xf32> to vector<8x8xf32>
      %c3_119 = arith.constant 3 : index
      %c0_120 = arith.constant 0 : index
      %c0_121 = arith.constant 0 : index
      %179 = vector.load %arg9[%c3_119, %c0_120, %c0_121] : memref<4x8x1xf32, #tpu.memory_space<vmem>>, vector<1x8x1xf32>
      %180 = vector.shape_cast %179 : vector<1x8x1xf32> to vector<8x1xf32>
      %181 = tpu.reciprocal %180 {approx = true} : vector<8x1xf32> -> vector<8x1xf32>
      %182 = vector.broadcast %181 : vector<8x1xf32> to vector<8x8xf32>
      %183 = arith.mulf %178, %182 : vector<8x8xf32>
      %184 = tpu.concatenate %162, %169, %176, %183 in 1 : vector<8x8xf32>, vector<8x8xf32>, vector<8x8xf32>, vector<8x8xf32> -> vector<8x32xf32>
      %185 = arith.truncf %184 : vector<8x32xf32> to vector<8x32xbf16>
      %c0_122 = arith.constant 0 : index
      %c0_123 = arith.constant 0 : index
      %c0_124 = arith.constant 0 : index
      %186 = vector.load %arg7[%c0_122, %c0_123, %c0_124] : memref<1x8x32xbf16, #tpu.memory_space<vmem>>, vector<1x8x32xbf16>
      %187 = vector.shape_cast %186 : vector<1x8x32xbf16> to vector<8x32xbf16>
      %188 = vector.shape_cast %185 : vector<8x32xbf16> to vector<1x8x32xbf16>
      tpu.vector_store %arg7[%c0_122, %c0_123, %c0_124], %188 {strides = array<i32>} : memref<1x8x32xbf16, #tpu.memory_space<vmem>>, vector<1x8x32xbf16>,
    } else {
    }
    return
  }
  func.func @transform_0(%arg0: i32, %arg1: i32, %arg2: i32, %arg3: i32) -> (i32, i32, i32, i32) {
    %c0_i32 = arith.constant 0 : i32
    %c0_i32_0 = arith.constant 0 : i32
    return %c0_i32, %arg0, %arg2, %arg1 : i32, i32, i32, i32
  }
  func.func @transform_1(%arg0: i32, %arg1: i32, %arg2: i32, %arg3: i32) -> (i32, i32, i32, i32) {
    %c1_i32 = arith.constant 1 : i32
    %c0_i32 = arith.constant 0 : i32
    return %c1_i32, %arg0, %arg3, %arg1 : i32, i32, i32, i32
  }
  func.func @transform_2(%arg0: i32, %arg1: i32, %arg2: i32, %arg3: i32) -> (i32, i32, i32, i32) {
    %c2_i32 = arith.constant 2 : i32
    %c0_i32 = arith.constant 0 : i32
    return %c2_i32, %arg0, %arg3, %arg1 : i32, i32, i32, i32
  }
  func.func @transform_3(%arg0: i32, %arg1: i32, %arg2: i32, %arg3: i32) -> (i32, i32, i32) {
    %c0_i32 = arith.constant 0 : i32
    return %arg0, %arg2, %arg1 : i32, i32, i32
  }
}

module attributes {stable_mosaic.version = 11 : i64} {
  func.func @_out_proj_kernel(%arg0: i32, %arg1: memref<16x32xbf16, #tpu.memory_space<vmem>>, %arg2: memref<32x32xbf16, #tpu.memory_space<vmem>>, %arg3: memref<1x32xf32, #tpu.memory_space<vmem>>, %arg4: memref<16x32xf32, #tpu.memory_space<vmem>>) attributes {dimension_semantics = [#tpu.dimension_semantics<parallel>], iteration_bounds = array<i64: 1>, scalar_prefetch = 0 : i64, scratch_operands = 0 : i64, tpu.core_type = #tpu.core_type<tc>, window_params = [{transform_indices = @transform_0, window_bounds = array<i64: 16, 32>}, {pipeline_mode = #tpu.pipeline_mode<synchronous>, transform_indices = @transform_1, window_bounds = array<i64: 32, 32>}, {pipeline_mode = #tpu.pipeline_mode<synchronous>, transform_indices = @transform_2, window_bounds = array<i64: 1, 32>}, {transform_indices = @transform_3, window_bounds = array<i64: 16, 32>}]} {
    %c0 = arith.constant 0 : index
    %c0_0 = arith.constant 0 : index
    %0 = vector.load %arg1[%c0, %c0_0] : memref<16x32xbf16, #tpu.memory_space<vmem>>, vector<16x32xbf16>
    %c0_1 = arith.constant 0 : index
    %c0_2 = arith.constant 0 : index
    %1 = vector.load %arg2[%c0_1, %c0_2] : memref<32x32xbf16, #tpu.memory_space<vmem>>, vector<32x32xbf16>
    %cst = arith.constant dense<0.000000e+00> : vector<16x32xf32>
    %2 = tpu.matmul %0, %1, %cst {dimension_numbers = #tpu.dot_dimension_numbers<[1], [1], [0], [0], [0, 0, 1, 0], [], []>} : vector<16x32xbf16>, vector<32x32xbf16>, vector<16x32xf32> -> vector<16x32xf32>
    %c0_3 = arith.constant 0 : index
    %c0_4 = arith.constant 0 : index
    %3 = vector.load %arg3[%c0_3, %c0_4] : memref<1x32xf32, #tpu.memory_space<vmem>>, vector<1x32xf32>
    %4 = vector.broadcast %3 : vector<1x32xf32> to vector<16x32xf32>
    %5 = arith.addf %2, %4 : vector<16x32xf32>
    %c0_5 = arith.constant 0 : index
    %c0_6 = arith.constant 0 : index
    %6 = vector.load %arg4[%c0_5, %c0_6] : memref<16x32xf32, #tpu.memory_space<vmem>>, vector<16x32xf32>
    tpu.vector_store %arg4[%c0_5, %c0_6], %5 {strides = array<i32>} : memref<16x32xf32, #tpu.memory_space<vmem>>, vector<16x32xf32>,
    return
  }
  func.func @transform_0(%arg0: i32) -> (i32, i32) {
    %c0_i32 = arith.constant 0 : i32
    %c0_i32_0 = arith.constant 0 : i32
    return %arg0, %c0_i32 : i32, i32
  }
  func.func @transform_1(%arg0: i32) -> (i32, i32) {
    %c0_i32 = arith.constant 0 : i32
    %c0_i32_0 = arith.constant 0 : i32
    %c0_i32_1 = arith.constant 0 : i32
    return %c0_i32, %c0_i32_0 : i32, i32
  }
  func.func @transform_2(%arg0: i32) -> (i32, i32) {
    %c0_i32 = arith.constant 0 : i32
    %c0_i32_0 = arith.constant 0 : i32
    %c0_i32_1 = arith.constant 0 : i32
    return %c0_i32, %c0_i32_0 : i32, i32
  }
  func.func @transform_3(%arg0: i32) -> (i32, i32) {
    %c0_i32 = arith.constant 0 : i32
    %c0_i32_0 = arith.constant 0 : i32
    return %arg0, %c0_i32 : i32, i32
  }
}

module attributes {stable_mosaic.version = 11 : i64} {
  func.func @_stacked_qkv_kernel(%arg0: i32, %arg1: i32, %arg2: memref<1x16x32xbf16, #tpu.memory_space<vmem>>, %arg3: memref<1x32x32xbf16, #tpu.memory_space<vmem>>, %arg4: memref<1x1x32xf32, #tpu.memory_space<vmem>>, %arg5: memref<1x16x32xbf16, #tpu.memory_space<vmem>>) attributes {dimension_semantics = [#tpu.dimension_semantics<parallel>, #tpu.dimension_semantics<parallel>], iteration_bounds = array<i64: 3, 1>, scalar_prefetch = 0 : i64, scratch_operands = 0 : i64, tpu.core_type = #tpu.core_type<tc>, window_params = [{transform_indices = @transform_0, window_bounds = array<i64: 1, 16, 32>}, {transform_indices = @transform_1, window_bounds = array<i64: 1, 32, 32>}, {transform_indices = @transform_2, window_bounds = array<i64: 1, 1, 32>}, {transform_indices = @transform_3, window_bounds = array<i64: 1, 16, 32>}]} {
    %c0 = arith.constant 0 : index
    %c0_0 = arith.constant 0 : index
    %c0_1 = arith.constant 0 : index
    %0 = vector.load %arg2[%c0, %c0_0, %c0_1] : memref<1x16x32xbf16, #tpu.memory_space<vmem>>, vector<1x16x32xbf16>
    %1 = vector.shape_cast %0 : vector<1x16x32xbf16> to vector<16x32xbf16>
    %c0_2 = arith.constant 0 : index
    %c0_3 = arith.constant 0 : index
    %c0_4 = arith.constant 0 : index
    %2 = vector.load %arg3[%c0_2, %c0_3, %c0_4] : memref<1x32x32xbf16, #tpu.memory_space<vmem>>, vector<1x32x32xbf16>
    %3 = vector.shape_cast %2 : vector<1x32x32xbf16> to vector<32x32xbf16>
    %cst = arith.constant dense<0.000000e+00> : vector<16x32xf32>
    %4 = tpu.matmul %1, %3, %cst {dimension_numbers = #tpu.dot_dimension_numbers<[1], [1], [0], [0], [0, 0, 1, 0], [], []>} : vector<16x32xbf16>, vector<32x32xbf16>, vector<16x32xf32> -> vector<16x32xf32>
    %c0_5 = arith.constant 0 : index
    %c0_6 = arith.constant 0 : index
    %c0_7 = arith.constant 0 : index
    %5 = vector.load %arg4[%c0_5, %c0_6, %c0_7] : memref<1x1x32xf32, #tpu.memory_space<vmem>>, vector<1x1x32xf32>
    %6 = vector.shape_cast %5 : vector<1x1x32xf32> to vector<1x32xf32>
    %7 = vector.broadcast %6 : vector<1x32xf32> to vector<16x32xf32>
    %8 = arith.addf %4, %7 : vector<16x32xf32>
    %9 = arith.truncf %8 : vector<16x32xf32> to vector<16x32xbf16>
    %c0_8 = arith.constant 0 : index
    %c0_9 = arith.constant 0 : index
    %c0_10 = arith.constant 0 : index
    %10 = vector.load %arg5[%c0_8, %c0_9, %c0_10] : memref<1x16x32xbf16, #tpu.memory_space<vmem>>, vector<1x16x32xbf16>
    %11 = vector.shape_cast %10 : vector<1x16x32xbf16> to vector<16x32xbf16>
    %12 = vector.shape_cast %9 : vector<16x32xbf16> to vector<1x16x32xbf16>
    tpu.vector_store %arg5[%c0_8, %c0_9, %c0_10], %12 {strides = array<i32>} : memref<1x16x32xbf16, #tpu.memory_space<vmem>>, vector<1x16x32xbf16>,
    return
  }
  func.func @transform_0(%arg0: i32, %arg1: i32) -> (i32, i32, i32) {
    %c0_i32 = arith.constant 0 : i32
    %c0_i32_0 = arith.constant 0 : i32
    return %arg0, %arg1, %c0_i32 : i32, i32, i32
  }
  func.func @transform_1(%arg0: i32, %arg1: i32) -> (i32, i32, i32) {
    %c0_i32 = arith.constant 0 : i32
    %c0_i32_0 = arith.constant 0 : i32
    %c0_i32_1 = arith.constant 0 : i32
    return %arg0, %c0_i32, %c0_i32_0 : i32, i32, i32
  }
  func.func @transform_2(%arg0: i32, %arg1: i32) -> (i32, i32, i32) {
    %c0_i32 = arith.constant 0 : i32
    %c0_i32_0 = arith.constant 0 : i32
    %c0_i32_1 = arith.constant 0 : i32
    return %arg0, %c0_i32, %c0_i32_0 : i32, i32, i32
  }
  func.func @transform_3(%arg0: i32, %arg1: i32) -> (i32, i32, i32) {
    %c0_i32 = arith.constant 0 : i32
    %c0_i32_0 = arith.constant 0 : i32
    return %arg0, %arg1, %c0_i32 : i32, i32, i32
  }
}

</mosaic_0001>

<bundles_post_ra>
// kernel: multi_headed_attention.3
= control target key start
LH: loop header
LB: loop body
LE: loop exit
PB: predicated region body
PF: predicated region fallthrough
CT: control target
= control target key end

     0   :  { %s554_s12 = smov 0   ;;  %s556_s13 = smov 0   ;;  %s593_s0 = inlined_call_operand.vmem [shape: bf16[3,16,32], index: 0, kind: input, shape index: {}]   ;;  %s594_s1 = inlined_call_operand.vmem [shape: bf16[3,32,32], index: 1, kind: input, shape index: {}]   ;;  %s595_s2 = inlined_call_operand.vmem [shape: f32[3,1,32], index: 2, kind: input, shape index: {}]   ;;  %s596_s3 = inlined_call_operand.vmem [shape: bf16[3,16,32], index: 3, kind: output, shape index: {}]  }
   0x1   :  { %s558_s14 = smov 0  }
   0x2 LB: > { %s25_s15 = sadd.s32 1, %s526_s13  ;;  %p447_p0 = scmp.ge.s32.totalorder %s530_s14, 1  ;;  %s530_s14 = sphi %s558_s14, %s13_s14   ;;  %s526_s13 = sphi %s556_s13, %s598_s13   ;;  %s522_s12 = sphi %s554_s12, %s597_s12  }
   0x3   : > { %p27_p1 = scmp.ge.s32.totalorder %s25_s15, 3  ;;  %p176_p2 = scmp.lt.s32.totalorder %s530_s14, 4 }
   0x5   : > { %s600_s15 = smov (%p27_p1, %s25_s15), 0  ;;  %p177_p3 = pnand %p447_p0, %p176_p2 }
   0x6   : > { %p217_p4 = scmp.lt.s32.totalorder (!%p177_p3), %s522_s12, 2 }
   0x7   : > { %180 = sbr.rel (%p177_p3) target bundleno = 234 (0xea), region = 32 }
   0xc   : > { %v532_v0 = vmov 0.0   ;;  %vm533_vm0 = vmmov 0   ;;  %s602_s12 = smov (!%p217_p4, %s522_s12), 2  ;;  %vm273_vm1 = vcmask 261120   ;;  %vm332_vm2 = vcmask 257024  }
   0xd   : > { %471 = vmatprep.subr.bf16.mxu0 %v532_v0  ;;  %475 = vmatprep.mubr.msk.bf16.mxu0 %vm533_vm0, %v532_v0  ;;  %s464_s16 = sshll.u32 %s602_s12, 4  ;;  %s463_s17 = sshll.u32 %s602_s12, 3 }
   0xe   : > { %s230_s20 = scalar_lea.vmem %s594_s1, %s464_s16  ;;  %s224_s23 = scalar_lea.vmem %s593_s0, %s463_s17 }
   0xf   : > { %v505_v1 = vld [vmem:[%s230_s20 + $0x8] sm:$0xff]   ;;  %v506_v3 = vld [vmem:[%s230_s20] sm:$0xff]   ;;  %s233_s26 = scalar_lea.vmem %s595_s2, %s602_s12  ;;  %s242_s29 = scalar_lea.vmem %s596_s3, %s463_s17 }
  0x10   : > { %v281_v2 = vsel %vm273_vm1, %v505_v1, 0  ;;  %v278_v4 = vsel %vm273_vm1, %v506_v3, 0  ;;  %v507_v5 = vld [vmem:[%s224_s23] sm:$0xff]  }
  0x11   : > { %472 = vmatpush3.bf16.xpose.msra.mxu0 %v281_v2  ;;  %v454_v6 = vld [vmem:[%s233_s26] ss:$0 sm:$0xff] }
  0x12   : > { %473 = vmatprep.subr.bf16.mxu0 %v532_v0 }
  0x19   : > { %474 = vmatpush3.bf16.xpose.msra.mxu0 %v278_v4 }
  0x20   : > { %476 = vmatmul.mubr.msk.bf16.vlgmr.msra.gmra.mxu0 %vm273_vm1, %v507_v5 }
  0xe0   : > { %v317_v7 = vpop.f32.mrf.mxu0 }
  0xe1   : > { %v318_v8 = vadd.f32 %v454_v6, %v317_v7 }
  0xe2   : > { %v477_v9 = vpop.f32.mrf.mxu0 }
  0xe3   : > { %v466_v10 = vpack.c.bf16 %v318_v8, %v318_v8 }
  0xe4   : > { %v320_v11 = vpop.f32.mrf.mxu0 }
  0xe5   : > { %333 = vst.msk [vmem:[%s242_s29] sm:$0xf] %vm332_vm2, %v466_v10  ;;  %v321_v12 = vadd.f32 %v454_v6, %v320_v11 }
  0xe6   : > { %v478_v13 = vpop.f32.mrf.mxu0 }
  0xe7   : > { %v467_v14 = vpack.c.bf16 %v321_v12, %v321_v12 }
  0xe9   : > { %334 = vst.msk [vmem:[%s242_s29 + $0x4] sm:$0xf] %vm332_vm2, %v467_v14 }
  0xea PF: > { %s13_s14 = sadd.s32 1, %s530_s14   ;;  %s597_s12 = smov %s526_s13 }
  0xeb   : > { %p10_p5 = scmp.ge.s32.totalorder %s13_s14, 5   ;;  %s598_s13 = smov %s600_s15 }
  0xed   :  { %12 = sbr.rel (!%p10_p5) target bundleno = 2 (0x2), region = 68 }

// kernel: multi_headed_attention.5
= control target key start
LH: loop header
LB: loop body
LE: loop exit
PB: predicated region body
PF: predicated region fallthrough
CT: control target
= control target key end

     0   :  { %v159_v1 = vmov 0.0   ;;  %vm44_vm0 = vcmask 261120   ;;  %vm160_vm1 = vmmov 0   ;;  %s204_s0 = inlined_call_operand.vmem [shape: bf16[16,32], index: 0, kind: input, shape index: {}]   ;;  %s205_s1 = inlined_call_operand.vmem [shape: bf16[32,32], index: 1, kind: input, shape index: {}]   ;;  %s206_s2 = inlined_call_operand.vmem [shape: f32[1,32], index: 2, kind: input, shape index: {}]   ;;  %s207_s3 = inlined_call_operand.hbm [shape: f32[16,32], index: 3, kind: output, shape index: {}]  }
   0x1   :  { %v134_v0 = vld [vmem:[%s205_s1 + $0x8] sm:$0xff]   ;;  %121 = vmatprep.subr.bf16.mxu0 %v159_v1  ;;  %125 = vmatprep.mubr.msk.bf16.mxu0 %vm160_vm1, %v159_v1 }
   0x2   :  { %v52_v2 = vsel %vm44_vm0, %v134_v0, 0 }
   0x3   :  { %122 = vmatpush3.bf16.xpose.msra.mxu0 %v52_v2 }
   0x4   :  { %8 = vsyncpa [#allocation3], 0  ;;  %123 = vmatprep.subr.bf16.mxu0 %v159_v1  ;;  %v135_v3 = vld [vmem:[%s205_s1] sm:$0xff]   ;;  %s161_s20 = smov [#allocation2]  }
   0x5   :  { %v49_v4 = vsel %vm44_vm0, %v135_v3, 0  ;;  %v136_v5 = vld [vmem:[%s204_s0] sm:$0xff]   ;;  %s102_s21 = sshll.u32 %s161_s20, 4  ;;  %s103_s21 = int_to_ptr.vmem [resolvable:$true] %s102_s21 }
   0x6   :  { %v113_v6 = vld [vmem:[%s206_s2] ss:$0 sm:$0xff]  ;;  %s137_s0 = scalar_lea.vmem %s103_s21, 256  ;;  %p142_p1 = scmp.lt.s32.totalorder %s103_s21, %s103_s21 }
   0x7   :  { %p138_p0 = scmp.ne.s32.totalorder %s103_s21, %s137_s0  ;;  %p143_p2 = scmp.lt.s32.totalorder %s137_s0, %s137_s0 }
   0x9   :  { %p144_p3 = por %p143_p2, %p142_p1 }
   0xb   :  { %124 = vmatpush3.bf16.xpose.msra.mxu0 %v49_v4  ;;  %p145_p4 = pnand %p144_p3, %p138_p0 }
  0x12   :  { %126 = vmatmul.mubr.msk.bf16.vlgmr.msra.gmra.mxu0 %vm44_vm0, %v136_v5 }
  0xd2   :  { %v88_v7 = vpop.f32.mrf.mxu0 }
  0xd3   :  { %v89_v8 = vadd.f32 %v113_v6, %v88_v7 }
  0xd4   :  { %v127_v9 = vpop.f32.mrf.mxu0 }
  0xd5   :  { %95 = vst.msk [vmem:[#allocation2] sm:$0xff] %vm44_vm0, %v89_v8 }
  0xd6   :  { %v91_v10 = vpop.f32.mrf.mxu0 }
  0xd7   :  { %v92_v11 = vadd.f32 %v113_v6, %v91_v10 }
  0xd8   :  { %v128_v12 = vpop.f32.mrf.mxu0 }
  0xd9   :  { %96 = vst.msk [vmem:[#allocation2 + $0x8] sm:$0xff] %vm44_vm0, %v92_v11 }
  0xda   :  { %148 = shalt.err (!%p145_p4)
}
  0xdb   :  { %s162_s1 = smov 128   ;;  %s163_s2 = smov 8  }
  0xdc   :  { %108 = dma.vmem_to_hbm [thread:$0]  %s103_s21, 256, %s207_s3, [#allocation3], %s162_s1, %s162_s1, %s163_s2  }
  0xdd   :  { %157 = dma.done.wait [#allocation3], 256  }
  0xde   :  { %158 = vsyncadd [#allocation3], 4294967040 }
  0xdf   :  { %112 = vsyncpa [#allocation3], 1 }

// kernel: multi_headed_attention.4
= control target key start
LH: loop header
LB: loop body
LE: loop exit
PB: predicated region body
PF: predicated region fallthrough
CT: control target
= control target key end

     0   :  { %s1277_s12 = smov 0   ;;  %s1279_s13 = smov 0   ;;  %s1437_s0 = inlined_call_operand.vmem [shape: bf16[3,2,8,32], index: 0, kind: input, shape index: {}, may-alias: {0,1,2}]   ;;  %s1438_s1 = inlined_call_operand.vmem [shape: bf16[3,2,8,32], index: 1, kind: input, shape index: {}, may-alias: {0,1,2}]   ;;  %s1439_s2 = inlined_call_operand.vmem [shape: bf16[3,2,8,32], index: 2, kind: input, shape index: {}, may-alias: {0,1,2}]   ;;  %s1440_s3 = inlined_call_operand.vmem [shape: bf16[2,8,32], index: 3, kind: output, shape index: {}]  }
   0x1   :  { %s1281_s14 = smov 0  }
   0x2 LB: > { %s39_s15 = sadd.s32 1, %s1241_s13  ;;  %p1077_p0 = scmp.ge.s32.totalorder %s1245_s14, 1  ;;  %s1245_s14 = sphi %s1281_s14, %s13_s14   ;;  %s1241_s13 = sphi %s1279_s13, %s1442_s13   ;;  %s1237_s12 = sphi %s1277_s12, %s1441_s12  }
   0x3   : > { %p41_p1 = scmp.ge.s32.totalorder %s39_s15, 2  ;;  %p216_p2 = scmp.lt.s32.totalorder %s1245_s14, 3 }
   0x5   : > { %s1444_s15 = smov (%p41_p1, %s39_s15), 0  ;;  %p217_p3 = pnand %p1077_p0, %p216_p2 }
   0x6   : > { %p272_p4 = scmp.lt.s32.totalorder (!%p217_p3), %s1237_s12, 1  ;;  %s1251_s23 = smov (!%p217_p3), 120  }
   0x7   : > { %220 = sbr.rel (%p217_p3) target bundleno = 1410 (0x582), region = 32  ;;  %s1252_s24 = smov (!%p217_p3), 112  }
   0x8   : > { %s1253_s25 = smov (!%p217_p3), 104   ;;  %s1254_s29 = smov (!%p217_p3), 8  }
   0x9   : > { %s1255_s30 = smov (!%p217_p3), 16   ;;  %s1256_s4 = smov (!%p217_p3), 24  }
   0xc   : > { %vm328_vm0 = vcmask 64512   ;;  %v1247_v0 = vmov 0.0   ;;  %vm1248_vm1 = vmmov 0   ;;  %s1446_s12 = smov (!%p272_p4, %s1237_s12), 1  ;;  %vm319_vm2 = vcmask 7168  }
   0xd   : > { %1113 = vmatprep.subr.bf16.mxu0 %v1247_v0  ;;  %329 = vst.msk [vmem:[#allocation4] sm:$0xff] %vm328_vm0, %v1247_v0  ;;  %330 = vst.msk [vmem:[#allocation4 + $0x8] sm:$0xff] %vm328_vm0, %v1247_v0  ;;  %1115 = vmatprep.mubr.msk.bf16.mxu0 %vm1248_vm1, %v1247_v0  ;;  %s1309_s16 = sshll.u32 %s1446_s12, 2  ;;  %v1249_v4 = vmov -inf   ;;  %v1250_v10 = vmov 0   ;;  %vm418_vm3 = vcmask 1043456  }
   0xe   : > { %331 = vst.msk [vmem:[#allocation4 + $0x10] sm:$0xff] %vm328_vm0, %v1247_v0  ;;  %332 = vst.msk [vmem:[#allocation4 + $0x18] sm:$0xff] %vm328_vm0, %v1247_v0  ;;  %1119 = vmatprep.subr.bf16.mxu1 %v1247_v0  ;;  %1121 = vmatprep.mubr.msk.bf16.mxu1 %vm1248_vm1, %v1247_v0  ;;  %s1008_s19 = scalar_lea.vmem %s1438_s1, %s1309_s16  ;;  %s281_s22 = scalar_lea.vmem %s1437_s0, %s1309_s16  ;;  %vm931_vm4 = vcmask 130048   ;;  %vm933_vm5 = vcmask 195584   ;;  %vm936_vm6 = vcmask 257024  }
   0xf   : > { %v1082_v1 = vld [vmem:[%s1008_s19 + $0x8] sm:$0xf]  ;;  %v333_v3 = vld [vmem:[%s281_s22] sm:$0xf]  ;;  %320 = vst.msk [vmem:[#allocation2] sm:$0xff] %vm319_vm2, %v1249_v4  ;;  %321 = vst.msk [vmem:[#allocation2 + $0x8] sm:$0xff] %vm319_vm2, %v1249_v4  ;;  %1195 = vset.pattern.permute.xlu0 %v1250_v10  ;;  %1196 = vset.pattern.permute.xlu1 %v1250_v10  ;;  %s1013_s28 = scalar_lea.vmem %s1439_s2, %s1309_s16  ;;  %s313_s7 = scalar_lea.vmem %s1440_s3, %s1309_s16 }
  0x10   : > { %v341_v2 = vsel %vm328_vm0, %v1082_v1, 0  ;;  %322 = vst.msk [vmem:[#allocation2 + $0x10] sm:$0xff] %vm319_vm2, %v1249_v4  ;;  %323 = vst.msk [vmem:[#allocation2 + $0x18] sm:$0xff] %vm319_vm2, %v1249_v4  ;;  %v1087_v11 = vcombine.low %v1082_v1, %v1082_v1  ;;  %v1086_v12 = vcombine.low %v333_v3, %v333_v3  ;;  %v1357_v17 = vld [vmem:[%s1013_s28 + $0x10] sm:$0xf] }
  0x11   : > { %1114 = vmatpush3.bf16.xpose.msra.mxu0 %v341_v2  ;;  %324 = vst.msk [vmem:[#allocation3] sm:$0xff] %vm319_vm2, %v1247_v0  ;;  %325 = vst.msk [vmem:[#allocation3 + $0x8] sm:$0xff] %vm319_vm2, %v1247_v0  ;;  %v420_v18 = vsel %vm418_vm3, %v1357_v17, 0  ;;  %v1089_v63 = vcombine.low %v1357_v17, %v1357_v17 }
  0x12   : > { %1131 = vmatprep.subr.bf16.mxu0 %v1247_v0  ;;  %326 = vst.msk [vmem:[#allocation3 + $0x10] sm:$0xff] %vm319_vm2, %v1247_v0  ;;  %327 = vst.msk [vmem:[#allocation3 + $0x18] sm:$0xff] %vm319_vm2, %v1247_v0  ;;  %473 = vrot.lane.b32.xlu1 %v1087_v11, %s1251_s23 }
  0x13   : > { %1120 = vmatpush3.bf16.msra.mxu1 %v420_v18 }
  0x14   : > { %1125 = vmatprep.subr.bf16.mxu1 %v1247_v0 }
  0x16   : > { %468 = vrot.lane.b32.xlu1 %v1086_v12, %s1251_s23  ;;  %v1343_v13 = vld [vmem:[#allocation2] sm:$0xff]  ;;  %v522_v52 = vld [vmem:[#allocation2 + $0x8] sm:$0xff] }
  0x17   : > { %v660_v56 = vld [vmem:[#allocation2 + $0x10] sm:$0xff]  ;;  %v795_v60 = vld [vmem:[#allocation2 + $0x18] sm:$0xff] }
  0x18   : > { %1116 = vmatmul.mubr.msk.bf16.vlgmr.msra.gmra.mxu0 %vm328_vm0, %v333_v3 }
  0x19   : > { %1133 = vmatprep.mubr.msk.bf16.mxu0 %vm1248_vm1, %v1247_v0 }
  0x1a   : > { %611 = vrot.lane.b32.xlu1 %v1087_v11, %s1252_s24 }
  0x1e   : > { %609 = vrot.lane.b32.xlu1 %v1086_v12, %s1252_s24 }
  0x22   : > { %746 = vrot.lane.b32.xlu1 %v1087_v11, %s1253_s25 }
  0x26   : > { %744 = vrot.lane.b32.xlu1 %v1086_v12, %s1253_s25 }
  0x84   : > { %v474_v22 = vpop.permute.xlu1 %473 }
  0x85   : > { %v479_v25 = vsel %vm328_vm0, %v474_v22, 0 }
  0x88   : > { %v469_v23 = vpop.permute.xlu1 %468 }
  0x8c   : > { %v612_v27 = vpop.permute.xlu1 %611 }
  0x8d   : > { %v617_v29 = vsel %vm328_vm0, %v612_v27, 0 }
  0x90   : > { %v610_v28 = vpop.permute.xlu1 %609 }
  0x94   : > { %v747_v30 = vpop.permute.xlu1 %746 }
  0x95   : > { %v752_v31 = vsel %vm328_vm0, %v747_v30, 0 }
  0x98   : > { %v745_v32 = vpop.permute.xlu1 %744 }
  0xd8   : > { %v377_v5 = vpop.f32.mrf.mxu0 }
  0xd9   : > { %v384_v6 = vsel %vm328_vm0, %v377_v5, -inf }
  0xda   : > { %385 = vmax.xlane.f32.xlu0 %v384_v6  ;;  %v1117_v7 = vpop.f32.mrf.mxu0 }
  0xdc   : > { %v380_v8 = vpop.f32.mrf.mxu0 }
  0xde   : > { %v1118_v9 = vpop.f32.mrf.mxu0 }
 0x163   : > { %v386_v14 = vpop.xlane.xlu0 %385 }
 0x164   : > { %v1346_v15 = vmax.f32 %v1343_v13, %v386_v14 }
 0x166   : > { %v388_v16 = vsub.f32 %v1343_v13, %v1346_v15  ;;  %464 = vst.msk [vmem:[#allocation2] sm:$0xff] %vm319_vm2, %v1346_v15  ;;  %393 = vperm.xlu0 %1195, %v1346_v15  }
 0x168   : > { %v389_v27 = vmul.f32 1.442695, %v388_v16 }
 0x1e1   : > { %v394_v19 = vpop.permute.xlu0 %393 }
 0x1e2   : > { %v396_v20 = vsub.f32 %v377_v5, %v394_v19 }
 0x1e4   : > { %v397_v21 = vmul.f32 1.442695, %v396_v20 }
 0x1e6   : > { %1199 = vpow2.f32 %v397_v21 }
 0x1f3   : > { %v1362_v24 = vpop.eup %1199 }
 0x1f4   : > { %v414_v26 = vpack.c.bf16 %v1362_v24, %v1362_v24  ;;  %v401_v2 = vsel %vm328_vm0, %v1362_v24, 0.0 }
 0x1f6   : > { %1122 = vmatmul.mubr.msk.bf16.vlgmr.msra.gmra.mxu1 %vm328_vm0, %v414_v26 }
 0x1f7   : > { %1126 = vmatpush3.bf16.xpose.msra.mxu1 %v479_v25  ;;  %1127 = vmatprep.mubr.msk.bf16.mxu1 %vm1248_vm1, %v1247_v0 }
 0x1f8   : > { %1137 = vmatprep.subr.bf16.mxu1 %v1247_v0 }
 0x1fe   : > { %1128 = vmatmul.mubr.msk.bf16.vlgmr.msra.gmra.mxu1 %vm328_vm0, %v469_v23 }
 0x1ff   : > { %1138 = vmatpush3.bf16.xpose.msra.mxu1 %v617_v29  ;;  %1139 = vmatprep.mubr.msk.bf16.mxu1 %vm1248_vm1, %v1247_v0 }
 0x200   : > { %1149 = vmatprep.subr.bf16.mxu1 %v1247_v0 }
 0x206   : > { %1140 = vmatmul.mubr.msk.bf16.vlgmr.msra.gmra.mxu1 %vm328_vm0, %v610_v28 }
 0x207   : > { %1150 = vmatpush3.bf16.xpose.msra.mxu1 %v752_v31  ;;  %1151 = vmatprep.mubr.msk.bf16.mxu1 %vm1248_vm1, %v1247_v0 }
 0x20e   : > { %1152 = vmatmul.mubr.msk.bf16.vlgmr.msra.gmra.mxu1 %vm328_vm0, %v745_v32 }
 0x2b6   : > { %v1381_v33 = vpop.f32.mrf.mxu1 }
 0x2b8   : > { %v1123_v34 = vpop.f32.mrf.mxu1 }
 0x2ba   : > { %v459_v35 = vpop.f32.mrf.mxu1 }
 0x2bb   : > { %v399_v35 = vld [vmem:[#allocation3] sm:$0xff] }
 0x2bc   : > { %v1124_v36 = vpop.f32.mrf.mxu1 }
 0x2be   : > { %v515_v37 = vpop.f32.mrf.mxu1 }
 0x2bf   : > { %v523_v38 = vsel %vm328_vm0, %v515_v37, -inf }
 0x2c0   : > { %524 = vmax.xlane.f32.xlu1 %v523_v38  ;;  %v1129_v39 = vpop.f32.mrf.mxu1 }
 0x2c2   : > { %v518_v40 = vpop.f32.mrf.mxu1 }
 0x2c4   : > { %v1130_v41 = vpop.f32.mrf.mxu1 }
 0x2c5   : > { %v539_v41 = vld [vmem:[#allocation3 + $0x8] sm:$0xff] }
 0x2c6   : > { %v653_v42 = vpop.f32.mrf.mxu1 }
 0x2c7   : > { %v661_v43 = vsel %vm328_vm0, %v653_v42, -inf }
 0x2c8   : > { %662 = vmax.xlane.f32.xlu0 %v661_v43  ;;  %v1141_v44 = vpop.f32.mrf.mxu1 }
 0x2ca   : > { %v656_v45 = vpop.f32.mrf.mxu1 }
 0x2cb   : > { %v677_v45 = vld [vmem:[#allocation3 + $0x10] sm:$0xff] }
 0x2cc   : > { %v1142_v46 = vpop.f32.mrf.mxu1 }
 0x2ce   : > { %v788_v47 = vpop.f32.mrf.mxu1 }
 0x2cf   : > { %v796_v48 = vsel %vm328_vm0, %v788_v47, -inf }
 0x2d0   : > { %797 = vmax.xlane.f32.xlu1 %v796_v48  ;;  %v1153_v49 = vpop.f32.mrf.mxu1 }
 0x2d2   : > { %v791_v50 = vpop.f32.mrf.mxu1 }
 0x2d3   : > { %v812_v50 = vld [vmem:[#allocation3 + $0x18] sm:$0xff] }
 0x2d4   : > { %v1154_v51 = vpop.f32.mrf.mxu1 }
 0x2d5   : > { %v407_v51 = vld [vmem:[#allocation4] sm:$0xff] }
 0x349   : > { %v525_v53 = vpop.xlane.xlu1 %524 }
 0x34a   : > { %v526_v54 = vmax.f32 %v522_v52, %v525_v53 }
 0x34c   : > { %v527_v55 = vsub.f32 %v522_v52, %v526_v54  ;;  %608 = vst.msk [vmem:[#allocation2 + $0x8] sm:$0xff] %vm319_vm2, %v526_v54  ;;  %532 = vperm.xlu1 %1196, %v526_v54  }
 0x34e   : > { %v528_v29 = vmul.f32 1.442695, %v527_v55 }
 0x351   : > { %v663_v57 = vpop.xlane.xlu0 %662 }
 0x352   : > { %v664_v58 = vmax.f32 %v660_v56, %v663_v57 }
 0x354   : > { %v665_v59 = vsub.f32 %v660_v56, %v664_v58  ;;  %743 = vst.msk [vmem:[#allocation2 + $0x10] sm:$0xff] %vm319_vm2, %v664_v58  ;;  %670 = vperm.xlu0 %1195, %v664_v58  }
 0x356   : > { %v666_v32 = vmul.f32 1.442695, %v665_v59 }
 0x359   : > { %v798_v61 = vpop.xlane.xlu1 %797 }
 0x35a   : > { %v799_v62 = vmax.f32 %v795_v60, %v798_v61 }
 0x35c   : > { %v800_v1 = vsub.f32 %v795_v60, %v799_v62  ;;  %878 = vst.msk [vmem:[#allocation2 + $0x18] sm:$0xff] %vm319_vm2, %v799_v62  ;;  %805 = vperm.xlu1 %1196, %v799_v62  }
 0x35e   : > { %v801_v31 = vmul.f32 1.442695, %v800_v1 }
 0x360   : > { %558 = vrot.lane.b32.xlu1 %v1089_v63, %s1251_s23 }
 0x364   : > { %693 = vrot.lane.b32.xlu1 %v1089_v63, %s1252_s24 }
 0x368   : > { %828 = vrot.lane.b32.xlu1 %v1089_v63, %s1253_s25  ;;  %v547_v63 = vld [vmem:[#allocation4 + $0x8] sm:$0xff] }
 0x38c   : > { %402 = vadd.xlane.f32.xlu1 %v401_v2 }
 0x3c7   : > { %v533_v3 = vpop.permute.xlu1 %532 }
 0x3c8   : > { %v535_v4 = vsub.f32 %v515_v37, %v533_v3 }
 0x3ca   : > { %v536_v5 = vmul.f32 1.442695, %v535_v4 }
 0x3cc   : > { %1201 = vpow2.f32 %v536_v5 }
 0x3cf   : > { %v671_v6 = vpop.permute.xlu0 %670 }
 0x3d0   : > { %v673_v7 = vsub.f32 %v653_v42, %v671_v6 }
 0x3d2   : > { %v674_v8 = vmul.f32 1.442695, %v673_v7 }
 0x3d4   : > { %1203 = vpow2.f32 %v674_v8 }
 0x3d7   : > { %v806_v9 = vpop.permute.xlu1 %805 }
 0x3d8   : > { %v808_v10 = vsub.f32 %v788_v47, %v806_v9 }
 0x3d9   : > { %v1202_v11 = vpop.eup %1201 }
 0x3da   : > { %v809_v12 = vmul.f32 1.442695, %v808_v10  ;;  %v541_v14 = vsel %vm328_vm0, %v1202_v11, 0.0  ;;  %v554_v19 = vpack.c.bf16 %v1202_v11, %v1202_v11 }
 0x3db   : > { %542 = vadd.xlane.f32.xlu0 %v541_v14  ;;  %v559_v17 = vpop.permute.xlu1 %558  ;;  %v820_v14 = vld [vmem:[#allocation4 + $0x18] sm:$0xff] }
 0x3dc   : > { %1205 = vpow2.f32 %v809_v12  ;;  %v564_v18 = vsel %vm418_vm3, %v559_v17, 0 }
 0x3dd   : > { %1132 = vmatpush3.bf16.msra.mxu0 %v564_v18  ;;  %1207 = vpow2.f32 %v389_v27 }
 0x3de   : > { %1143 = vmatprep.subr.bf16.mxu0 %v1247_v0  ;;  %1209 = vpow2.f32 %v528_v29 }
 0x3df   : > { %v694_v20 = vpop.permute.xlu1 %693  ;;  %1211 = vpow2.f32 %v801_v31 }
 0x3e0   : > { %1134 = vmatmul.mubr.msk.bf16.vlgmr.msra.gmra.mxu0 %vm328_vm0, %v554_v19  ;;  %v699_v21 = vsel %vm418_vm3, %v694_v20, 0  ;;  %1213 = vpow2.f32 %v666_v32 }
 0x3e1   : > { %v1204_v22 = vpop.eup %1203  ;;  %1144 = vmatpush3.bf16.msra.mxu0 %v699_v21  ;;  %1145 = vmatprep.mubr.msk.bf16.mxu0 %vm1248_vm1, %v1247_v0 }
 0x3e2   : > { %v679_v23 = vsel %vm328_vm0, %v1204_v22, 0.0  ;;  %1155 = vmatprep.subr.bf16.mxu0 %v1247_v0  ;;  %v692_v25 = vpack.c.bf16 %v1204_v22, %v1204_v22 }
 0x3e3   : > { %680 = vadd.xlane.f32.xlu0 %v679_v23  ;;  %v829_v24 = vpop.permute.xlu1 %828 }
 0x3e4   : > { %v834_v26 = vsel %vm418_vm3, %v829_v24, 0 }
 0x3e8   : > { %1146 = vmatmul.mubr.msk.bf16.vlgmr.msra.gmra.mxu0 %vm328_vm0, %v692_v25 }
 0x3e9   : > { %v1206_v28 = vpop.eup %1205  ;;  %1156 = vmatpush3.bf16.msra.mxu0 %v834_v26  ;;  %1157 = vmatprep.mubr.msk.bf16.mxu0 %vm1248_vm1, %v1247_v0 }
 0x3ea   : > { %v814_v30 = vsel %vm328_vm0, %v1206_v28, 0.0  ;;  %v827_v34 = vpack.c.bf16 %v1206_v28, %v1206_v28  ;;  %v1208_v13 = vpop.eup %1207 }
 0x3eb   : > { %815 = vadd.xlane.f32.xlu1 %v814_v30  ;;  %v1210_v15 = vpop.eup %1209  ;;  %v400_v36 = vmul.f32 %v1208_v13, %v399_v35 }
 0x3ec   : > { %v1212_v16 = vpop.eup %1211  ;;  %v540_v42 = vmul.f32 %v1210_v15, %v539_v41 }
 0x3ed   : > { %v1214_v0 = vpop.eup %1213  ;;  %v813_v52 = vmul.f32 %v1212_v16, %v812_v50 }
 0x3ee   : > { %v678_v46 = vmul.f32 %v1214_v0, %v677_v45 }
 0x3f0   : > { %1158 = vmatmul.mubr.msk.bf16.vlgmr.msra.gmra.mxu0 %vm328_vm0, %v827_v34 }
 0x3f9   : > { %410 = vperm.xlu0 %1195, %v1208_v13  }
 0x3fc   : > { %550 = vperm.xlu1 %1196, %v1210_v15  }
 0x3fd   : > { %823 = vperm.xlu0 %1195, %v1212_v16  }
 0x400   : > { %688 = vperm.xlu1 %1196, %v1214_v0  }
 0x415   : > { %v403_v37 = vpop.xlane.xlu1 %402 }
 0x416   : > { %v404_v38 = vadd.f32 %v403_v37, %v400_v36 }
 0x418   : > { %406 = vst.msk [vmem:[#allocation3] sm:$0xff] %vm319_vm2, %v404_v38 }
 0x41f   : > { %v883_v39 = vld [vmem:[#allocation3] sm:$0xff] }
 0x420   : > { %1215 = vrcp.f32 %v883_v39 }
 0x42d   : > { %v1216_v40 = vpop.eup %1215 }
 0x42e   : > { %887 = vperm.xlu1 %1196, %v1216_v40  }
 0x464   : > { %v543_v43 = vpop.xlane.xlu0 %542 }
 0x465   : > { %v544_v44 = vadd.f32 %v543_v43, %v540_v42 }
 0x467   : > { %545 = vst.msk [vmem:[#allocation3 + $0x8] sm:$0xff] %vm319_vm2, %v544_v44 }
 0x46c   : > { %v681_v47 = vpop.xlane.xlu0 %680 }
 0x46d   : > { %v682_v48 = vadd.f32 %v681_v47, %v678_v46 }
 0x46e   : > { %v892_v49 = vld [vmem:[#allocation3 + $0x8] sm:$0xff] }
 0x46f   : > { %683 = vst.msk [vmem:[#allocation3 + $0x10] sm:$0xff] %vm319_vm2, %v682_v48  ;;  %1217 = vrcp.f32 %v892_v49 }
 0x474   : > { %v816_v53 = vpop.xlane.xlu1 %815  ;;  %v411_v54 = vpop.permute.xlu0 %410 }
 0x475   : > { %v817_v55 = vadd.f32 %v816_v53, %v813_v52  ;;  %v413_v56 = vmul.f32 %v411_v54, %v407_v51 }
 0x476   : > { %v901_v57 = vld [vmem:[#allocation3 + $0x10] sm:$0xff] }
 0x477   : > { %818 = vst.msk [vmem:[#allocation3 + $0x18] sm:$0xff] %vm319_vm2, %v817_v55  ;;  %v462_v58 = vadd.f32 %v1381_v33, %v413_v56  ;;  %1219 = vrcp.f32 %v901_v57  ;;  %v685_v33 = vld [vmem:[#allocation4 + $0x10] sm:$0xff] }
 0x478   : > { %v551_v1 = vpop.permute.xlu1 %550  ;;  %v824_v17 = vpop.permute.xlu0 %823 }
 0x479   : > { %463 = vst.msk [vmem:[#allocation4] sm:$0xff] %vm328_vm0, %v462_v58  ;;  %v553_v2 = vmul.f32 %v551_v1, %v547_v63  ;;  %v826_v20 = vmul.f32 %v824_v17, %v820_v14 }
 0x47c   : > { %v1218_v59 = vpop.eup %1217  ;;  %v689_v6 = vpop.permute.xlu1 %688 }
 0x47d   : > { %896 = vperm.xlu0 %1195, %v1218_v59   ;;  %v691_v9 = vmul.f32 %v689_v6, %v685_v33 }
 0x47e   : > { %v910_v60 = vld [vmem:[#allocation3 + $0x18] sm:$0xff] }
 0x47f   : > { %1221 = vrcp.f32 %v910_v60 }
 0x480   : > { %v882_v16 = vld [vmem:[#allocation4] sm:$0xff] }
 0x484   : > { %v1220_v61 = vpop.eup %1219 }
 0x485   : > { %905 = vperm.xlu1 %1196, %v1220_v61  }
 0x48c   : > { %v1222_v62 = vpop.eup %1221 }
 0x48d   : > { %914 = vperm.xlu0 %1195, %v1222_v62  }
 0x4a0   : > { %v600_v3 = vpop.f32.mrf.mxu0 }
 0x4a1   : > { %v606_v4 = vadd.f32 %v600_v3, %v553_v2 }
 0x4a2   : > { %v1135_v5 = vpop.f32.mrf.mxu0 }
 0x4a3   : > { %607 = vst.msk [vmem:[#allocation4 + $0x8] sm:$0xff] %vm328_vm0, %v606_v4 }
 0x4a4   : > { %v603_v7 = vpop.f32.mrf.mxu0 }
 0x4a6   : > { %v1136_v8 = vpop.f32.mrf.mxu0 }
 0x4a8   : > { %v735_v10 = vpop.f32.mrf.mxu0 }
 0x4a9   : > { %v741_v11 = vadd.f32 %v735_v10, %v691_v9  ;;  %v888_v29 = vpop.permute.xlu1 %887 }
 0x4aa   : > { %v1147_v12 = vpop.f32.mrf.mxu0  ;;  %v891_v27 = vld [vmem:[#allocation4 + $0x8] sm:$0xff]  ;;  %v890_v35 = vmul.f32 %v888_v29, %v882_v16 }
 0x4ab   : > { %742 = vst.msk [vmem:[#allocation4 + $0x10] sm:$0xff] %vm328_vm0, %v741_v11 }
 0x4ac   : > { %v738_v18 = vpop.f32.mrf.mxu0 }
 0x4ae   : > { %v1148_v19 = vpop.f32.mrf.mxu0 }
 0x4b0   : > { %v870_v21 = vpop.f32.mrf.mxu0 }
 0x4b1   : > { %v876_v22 = vadd.f32 %v870_v21, %v826_v20 }
 0x4b2   : > { %v1159_v23 = vpop.f32.mrf.mxu0  ;;  %v900_v31 = vld [vmem:[#allocation4 + $0x10] sm:$0xff] }
 0x4b3   : > { %877 = vst.msk [vmem:[#allocation4 + $0x18] sm:$0xff] %vm328_vm0, %v876_v22 }
 0x4b4   : > { %v873_v24 = vpop.f32.mrf.mxu0 }
 0x4b6   : > { %v1160_v25 = vpop.f32.mrf.mxu0 }
 0x4ba   : > { %v909_v13 = vld [vmem:[#allocation4 + $0x18] sm:$0xff] }
 0x4f8   : > { %v897_v26 = vpop.permute.xlu0 %896 }
 0x4f9   : > { %v899_v28 = vmul.f32 %v897_v26, %v891_v27 }
 0x4fb   : > { %919 = vrot.lane.b32.xlu1 %v899_v28, %s1254_s29 }
 0x500   : > { %v906_v30 = vpop.permute.xlu1 %905 }
 0x501   : > { %v908_v32 = vmul.f32 %v906_v30, %v900_v31 }
 0x503   : > { %923 = vrot.lane.b32.xlu0 %v908_v32, %s1255_s30 }
 0x508   : > { %v915_v34 = vpop.permute.xlu0 %914 }
 0x509   : > { %v917_v15 = vmul.f32 %v915_v34, %v909_v13 }
 0x50b   : > { %927 = vrot.lane.b32.xlu1 %v917_v15, %s1256_s4 }
 0x56d   : > { %v920_v0 = vpop.permute.xlu1 %919 }
 0x56e   : > { %v930_v37 = vsel %vm328_vm0, %v890_v35, %v920_v0 }
 0x575   : > { %v924_v36 = vpop.permute.xlu0 %923 }
 0x576   : > { %v932_v38 = vsel %vm931_vm4, %v930_v37, %v924_v36 }
 0x57d   : > { %v928_v39 = vpop.permute.xlu1 %927 }
 0x57e   : > { %v934_v40 = vsel %vm933_vm5, %v932_v38, %v928_v39 }
 0x57f   : > { %v935_v41 = vpack.c.bf16 %v934_v40, %v934_v40 }
 0x581   : > { %937 = vst.msk [vmem:[%s313_s7] sm:$0xf] %vm936_vm6, %v935_v41 }
 0x582 PF: > { %s13_s14 = sadd.s32 1, %s1245_s14   ;;  %s1441_s12 = smov %s1241_s13 }
 0x583   : > { %p10_p5 = scmp.ge.s32.totalorder %s13_s14, 4   ;;  %s1442_s13 = smov %s1444_s15 }
 0x585   :  { %12 = sbr.rel (!%p10_p5) target bundleno = 2 (0x2), region = 85 }

</bundles_post_ra>
